<compile_context>
chip_gen: v6e
topology: v6e:2x2x1
jax: 0.10.0
libtpu: 0.0.40
codegen_flags: <defaults>
</compile_context>

<pallas_src>
import jax
import jax.numpy as jnp
from jax.experimental import pallas as pl
from jax.experimental.pallas import tpu as pltpu


def _se_kernel(x_ref, w1_ref, w2_ref, o_ref):
    """Fused SE for a (TB, C, S) tile.

    x_ref:  (TB, C, S)  batch tile; channels on sublanes, spatial on lanes
    w1_ref: (Cr, C)     fc1 weight (PyTorch layout, no bias)
    w2_ref: (C, Cr)     fc2 weight (PyTorch layout, no bias)
    o_ref:  (TB, C, S)
    """
    x = x_ref[...]                                              # (TB, C, S)
    inv_s = jnp.float32(1.0 / x.shape[-1])

    # Squeeze: global average over the spatial (lane) axis, f32 accumulation.
    mean = jnp.sum(x, axis=-1, dtype=jnp.float32) * inv_s       # (TB, C)

    # Excite: fc1 -> ReLU -> fc2 -> sigmoid.  Contract against the weights'
    # last dim (transposed-RHS matmul) so no transpose is materialized.
    h = jax.lax.dot_general(mean, w1_ref[...],
                            dimension_numbers=(((1,), (1,)), ((), ())),
                            preferred_element_type=jnp.float32)  # (TB, Cr)
    h = jnp.maximum(h, 0.0)
    g = jax.lax.dot_general(h, w2_ref[...],
                            dimension_numbers=(((1,), (1,)), ((), ())),
                            preferred_element_type=jnp.float32)  # (TB, C)
    gate = jax.nn.sigmoid(g)                                     # (TB, C)

    # Scale: per-(batch, channel) gate broadcast across the lane (spatial) axis.
    gate = gate.astype(x.dtype)[:, :, None]                      # (TB, C, 1)
    o_ref[...] = (x * gate).astype(o_ref.dtype)


def _pick_batch_tile(batch, per_elem_bytes, budget_bytes=8 << 20):
    """Largest divisor of `batch` whose double-buffered in+out footprint fits."""
    best = 1
    for tb in range(1, batch + 1):
        if batch % tb == 0 and 4 * tb * per_elem_bytes <= budget_bytes:
            best = tb
    return best


def se_forward(x_ncdhw, w1, w2):
    """x_ncdhw: (B, C, D, H, W); w1: (C//r, C); w2: (C, C//r) -> (B, C, D, H, W)."""
    B, C, D, H, W = x_ncdhw.shape
    Cr = w1.shape[0]
    S = D * H * W

    # Trailing-dim merge only (contiguous) -> no transpose, no HBM copy.
    xf = x_ncdhw.reshape(B, C, S)

    per_elem = C * S * x_ncdhw.dtype.itemsize
    TB = _pick_batch_tile(B, per_elem)
    grid = (B // TB,)

    # Rough VMEM estimate: double-buffered in + out tiles, weights, headroom.
    vmem_est = 4 * TB * per_elem + 4 * (Cr * C + C * Cr) * w1.dtype.itemsize + (1 << 20)
    cp_kwargs = dict(dimension_semantics=("parallel",))
    if vmem_est > (16 << 20):
        # Raise the scoped-VMEM limit for large volumes (capped at v7x physical).
        cp_kwargs["vmem_limit_bytes"] = int(min(vmem_est, 64 << 20))

    out = pl.pallas_call(
        _se_kernel,
        out_shape=jax.ShapeDtypeStruct((B, C, S), x_ncdhw.dtype),
        grid=grid,
        in_specs=[
            pl.BlockSpec((TB, C, S), lambda b: (b, 0, 0)),   # batch tile of x
            pl.BlockSpec((Cr, C), lambda b: (0, 0)),         # fc1 weight (resident)
            pl.BlockSpec((C, Cr), lambda b: (0, 0)),         # fc2 weight (resident)
        ],
        out_specs=pl.BlockSpec((TB, C, S), lambda b: (b, 0, 0)),
        compiler_params=pltpu.CompilerParams(**cp_kwargs),
    )(xf, w1, w2)
    return out.reshape(B, C, D, H, W)


def _se_reference(x, w1, w2):
    """Pure-JAX reference matching the PyTorch forward."""
    y = jnp.mean(x, axis=(2, 3, 4))                            # (B, C)
    y = jnp.maximum(y @ w1.T, 0.0)                             # (B, Cr)
    y = jax.nn.sigmoid(y @ w2.T)                               # (B, C)
    return x * y[:, :, None, None, None]


if __name__ == "__main__":
    B, C, D, H, W = 2, 64, 8, 8, 8
    reduction = 16
    Cr = C // reduction

    key = jax.random.PRNGKey(0)
    kx, k1, k2 = jax.random.split(key, 3)

    # Input in PyTorch's (B, C, D, H, W) convention.
    x = jax.random.normal(kx, (B, C, D, H, W), jnp.float32)

    # Linear weights in PyTorch layout (out_features, in_features), bias=False.
    w1 = (1.0 / jnp.sqrt(C)) * jax.random.normal(k1, (Cr, C), jnp.float32)
    w2 = (1.0 / jnp.sqrt(Cr)) * jax.random.normal(k2, (C, Cr), jnp.float32)

    fwd = jax.jit(se_forward)
    out = fwd(x, w1, w2)
    jax.block_until_ready(out)

    assert out.shape == (B, C, D, H, W), out.shape
    ref = _se_reference(x, w1, w2)
    assert jnp.allclose(out, ref, rtol=1e-4, atol=1e-4), float(jnp.max(jnp.abs(out - ref)))
    print("KERNEL_OK")
</pallas_src>

<mosaic_0001>
module attributes {stable_mosaic.version = 11 : i64} {
  func.func @_se_kernel(%arg0: i32, %arg1: memref<2x64x512xf32, #tpu.memory_space<vmem>>, %arg2: memref<4x64xf32, #tpu.memory_space<vmem>>, %arg3: memref<64x4xf32, #tpu.memory_space<vmem>>, %arg4: memref<2x64x512xf32, #tpu.memory_space<vmem>>) attributes {dimension_semantics = [#tpu.dimension_semantics<parallel>], iteration_bounds = array<i64: 1>, scalar_prefetch = 0 : i64, scratch_operands = 0 : i64, tpu.core_type = #tpu.core_type<tc>, window_params = [{transform_indices = @transform_0, window_bounds = array<i64: 2, 64, 512>}, {pipeline_mode = #tpu.pipeline_mode<synchronous>, transform_indices = @transform_1, window_bounds = array<i64: 4, 64>}, {pipeline_mode = #tpu.pipeline_mode<synchronous>, transform_indices = @transform_2, window_bounds = array<i64: 64, 4>}, {transform_indices = @transform_3, window_bounds = array<i64: 2, 64, 512>}]} {
    %c0 = arith.constant 0 : index
    %c0_0 = arith.constant 0 : index
    %c0_1 = arith.constant 0 : index
    %0 = vector.load %arg1[%c0, %c0_0, %c0_1] : memref<2x64x512xf32, #tpu.memory_space<vmem>>, vector<2x64x512xf32>
    %cst = arith.constant dense<0.000000e+00> : vector<2x64xf32>
    %1 = vector.multi_reduction <add>, %0, %cst [2] : vector<2x64x512xf32> to vector<2x64xf32>
    %cst_2 = arith.constant 0.001953125 : f32
    %2 = vector.broadcast %cst_2 : f32 to vector<2x64xf32>
    %3 = arith.mulf %1, %2 : vector<2x64xf32>
    %c0_3 = arith.constant 0 : index
    %c0_4 = arith.constant 0 : index
    %4 = vector.load %arg2[%c0_3, %c0_4] : memref<4x64xf32, #tpu.memory_space<vmem>>, vector<4x64xf32>
    %cst_5 = arith.constant dense<0.000000e+00> : vector<2x4xf32>
    %5 = tpu.matmul %3, %4, %cst_5 {dimension_numbers = #tpu.dot_dimension_numbers<[1], [1], [0], [0], [0, 0, 1, 0], [], []>} : vector<2x64xf32>, vector<4x64xf32>, vector<2x4xf32> -> vector<2x4xf32>
    %cst_6 = arith.constant 0.000000e+00 : f32
    %6 = vector.broadcast %cst_6 : f32 to vector<2x4xf32>
    %7 = arith.maximumf %5, %6 : vector<2x4xf32>
    %c0_7 = arith.constant 0 : index
    %c0_8 = arith.constant 0 : index
    %8 = vector.load %arg3[%c0_7, %c0_8] : memref<64x4xf32, #tpu.memory_space<vmem>>, vector<64x4xf32>
    %cst_9 = arith.constant dense<0.000000e+00> : vector<2x64xf32>
    %9 = tpu.matmul %7, %8, %cst_9 {dimension_numbers = #tpu.dot_dimension_numbers<[1], [1], [0], [0], [0, 0, 1, 0], [], []>} : vector<2x4xf32>, vector<64x4xf32>, vector<2x64xf32> -> vector<2x64xf32>
    %10 = arith.negf %9 : vector<2x64xf32>
    %11 = math.exp %10 : vector<2x64xf32>
    %cst_10 = arith.constant 1.000000e+00 : f32
    %12 = vector.broadcast %cst_10 : f32 to vector<2x64xf32>
    %13 = arith.addf %12, %11 : vector<2x64xf32>
    %14 = arith.divf %12, %13 : vector<2x64xf32>
    %15 = vector.shape_cast %14 : vector<2x64xf32> to vector<2x64x1xf32>
    %16 = vector.broadcast %15 : vector<2x64x1xf32> to vector<2x64x512xf32>
    %17 = arith.mulf %0, %16 : vector<2x64x512xf32>
    %c0_11 = arith.constant 0 : index
    %c0_12 = arith.constant 0 : index
    %c0_13 = arith.constant 0 : index
    %18 = vector.load %arg4[%c0_11, %c0_12, %c0_13] : memref<2x64x512xf32, #tpu.memory_space<vmem>>, vector<2x64x512xf32>
    tpu.vector_store %arg4[%c0_11, %c0_12, %c0_13], %17 {strides = array<i32>} : memref<2x64x512xf32, #tpu.memory_space<vmem>>, vector<2x64x512xf32>,
    return
  }
  func.func @transform_0(%arg0: i32) -> (i32, i32, i32) {
    %c0_i32 = arith.constant 0 : i32
    %c0_i32_0 = arith.constant 0 : i32
    %c0_i32_1 = arith.constant 0 : i32
    return %arg0, %c0_i32, %c0_i32_0 : i32, i32, i32
  }
  func.func @transform_1(%arg0: i32) -> (i32, i32) {
    %c0_i32 = arith.constant 0 : i32
    %c0_i32_0 = arith.constant 0 : i32
    %c0_i32_1 = arith.constant 0 : i32
    return %c0_i32, %c0_i32_0 : i32, i32
  }
  func.func @transform_2(%arg0: i32) -> (i32, i32) {
    %c0_i32 = arith.constant 0 : i32
    %c0_i32_0 = arith.constant 0 : i32
    %c0_i32_1 = arith.constant 0 : i32
    return %c0_i32, %c0_i32_0 : i32, i32
  }
  func.func @transform_3(%arg0: i32) -> (i32, i32, i32) {
    %c0_i32 = arith.constant 0 : i32
    %c0_i32_0 = arith.constant 0 : i32
    %c0_i32_1 = arith.constant 0 : i32
    return %arg0, %c0_i32, %c0_i32_0 : i32, i32, i32
  }
}

</mosaic_0001>

<bundles_post_ra>
// kernel: se_forward.1
= control target key start
LH: loop header
LB: loop body
LE: loop exit
PB: predicated region body
PF: predicated region fallthrough
CT: control target
= control target key end

     0   :  { %vm287_vm0 = vcmask 523264   ;;  %vm732_vm1 = vmmov 0   ;;  %vm372_vm2 = vcmask 31744   ;;  %vm202_vm3 = vcmask 130112   ;;  %s1455_s0 = inlined_call_operand.vmem [shape: f32[2,64,512], index: 0, kind: input, shape index: {}]   ;;  %s1456_s1 = inlined_call_operand.vmem [shape: f32[4,64], index: 1, kind: input, shape index: {}]   ;;  %s1457_s2 = inlined_call_operand.vmem [shape: f32[64,4], index: 2, kind: input, shape index: {}]   ;;  %s1458_s3 = inlined_call_operand.vmem [shape: f32[2,64,512], index: 3, kind: output, shape index: {}]  }
   0x1   :  { %v756_v0 = vld [vmem:[%s1455_s0 + $0x100] sm:$0xff]  ;;  %v761_v1 = vld [vmem:[%s1455_s0 + $0x108] sm:$0xff]  ;;  %v766_v2 = vld [vmem:[%s1455_s0 + $0x110] sm:$0xff]  ;;  %vm209_vm4 = vcmask 195712   ;;  %vm216_vm5 = vcmask 261312   ;;  %vm223_vm6 = vcmask 326912  }
   0x2   :  { %1498 = vst [vmem:[#allocation2_spill] sm:$0xff] %v756_v0  ;;  %1499 = vst [vmem:[#allocation3_spill] sm:$0xff] %v761_v1  ;;  %v118_v3 = vadd.f32 %v761_v1, %v756_v0  ;;  %v773_v4 = vld [vmem:[%s1455_s0] sm:$0xff]  ;;  %v778_v5 = vld [vmem:[%s1455_s0 + $0x8] sm:$0xff]  ;;  %vm230_vm7 = vcmask 392512   ;;  %vm237_vm8 = vcmask 458112  }
   0x3   :  { %1500 = vst [vmem:[#allocation4_spill] sm:$0xff] %v766_v2  ;;  %v783_v6 = vld [vmem:[%s1455_s0 + $0x118] sm:$0xff]  ;;  %v788_v7 = vld [vmem:[%s1455_s0 + $0x10] sm:$0xff]  ;;  %v78_v8 = vadd.f32 %v778_v5, %v773_v4  ;;  %v795_v9 = vld [vmem:[%s1455_s0 + $0x120] sm:$0xff]  ;;  %vm244_vm9 = vcmask 523712   ;;  %vm285_vm10 = vcmask 1041409  }
   0x4   :  { %1501 = vst [vmem:[#allocation5_spill] sm:$0xff] %v783_v6  ;;  %1502 = vst [vmem:[#allocation6_spill] sm:$0xff] %v795_v9  ;;  %v119_v10 = vadd.f32 %v118_v3, %v766_v2  ;;  %v801_v11 = vld [vmem:[%s1455_s0 + $0x18] sm:$0xff]  ;;  %v806_v12 = vld [vmem:[%s1455_s0 + $0x128] sm:$0xff] }
   0x5   :  { %1503 = vst [vmem:[#allocation7_spill] sm:$0xff] %v806_v12  ;;  %v811_v13 = vld [vmem:[%s1455_s0 + $0x130] sm:$0xff]  ;;  %v79_v14 = vadd.f32 %v78_v8, %v788_v7  ;;  %v123_v15 = vadd.f32 %v806_v12, %v795_v9  ;;  %v819_v16 = vld [vmem:[%s1455_s0 + $0x20] sm:$0xff]  ;;  %v824_v17 = vld [vmem:[%s1455_s0 + $0x28] sm:$0xff] }
   0x6   :  { %1504 = vst [vmem:[#allocation8_spill] sm:$0xff] %v811_v13  ;;  %v829_v18 = vld [vmem:[%s1455_s0 + $0x30] sm:$0xff]  ;;  %v120_v19 = vadd.f32 %v119_v10, %v783_v6  ;;  %v835_v20 = vld [vmem:[%s1455_s0 + $0x138] sm:$0xff]  ;;  %v83_v21 = vadd.f32 %v824_v17, %v819_v16  ;;  %v842_v22 = vld [vmem:[%s1455_s0 + $0x140] sm:$0xff] }
   0x7   :  { %1505 = vst [vmem:[#allocation9_spill] sm:$0xff] %v835_v20  ;;  %1506 = vst [vmem:[#allocation10_spill] sm:$0xff] %v842_v22  ;;  %v847_v23 = vld [vmem:[%s1455_s0 + $0x148] sm:$0xff]  ;;  %v80_v24 = vadd.f32 %v79_v14, %v801_v11  ;;  %v124_v25 = vadd.f32 %v123_v15, %v811_v13  ;;  %v854_v26 = vld [vmem:[%s1455_s0 + $0x38] sm:$0xff] }
   0x8   :  { %1507 = vst [vmem:[#allocation11_spill] sm:$0xff] %v847_v23  ;;  %v859_v27 = vld [vmem:[%s1455_s0 + $0x150] sm:$0xff]  ;;  %v128_v28 = vadd.f32 %v847_v23, %v842_v22  ;;  %v866_v29 = vld [vmem:[%s1455_s0 + $0x40] sm:$0xff]  ;;  %121 = vadd.xlane.f32.xlu1 %v120_v19  ;;  %v84_v30 = vadd.f32 %v83_v21, %v829_v18  ;;  %v872_v31 = vld [vmem:[%s1455_s0 + $0x158] sm:$0xff] }
   0x9   :  { %1508 = vst [vmem:[#allocation12_spill] sm:$0xff] %v859_v27  ;;  %1509 = vst [vmem:[#allocation13_spill] sm:$0xff] %v872_v31  ;;  %v877_v32 = vld [vmem:[%s1455_s0 + $0x48] sm:$0xff]  ;;  %v882_v33 = vld [vmem:[%s1455_s0 + $0x50] sm:$0xff]  ;;  %81 = vadd.xlane.f32.xlu0 %v80_v24  ;;  %v125_v34 = vadd.f32 %v124_v25, %v835_v20 }
   0xa   :  { %v129_v35 = vadd.f32 %v128_v28, %v859_v27  ;;  %v88_v36 = vadd.f32 %v877_v32, %v866_v29  ;;  %v891_v37 = vld [vmem:[%s1455_s0 + $0x160] sm:$0xff]  ;;  %v896_v38 = vld [vmem:[%s1455_s0 + $0x168] sm:$0xff]  ;;  %v901_v39 = vld [vmem:[%s1455_s0 + $0x170] sm:$0xff]  ;;  %v85_v40 = vadd.f32 %v84_v30, %v854_v26 }
   0xb   :  { %1510 = vst [vmem:[#allocation14_spill] sm:$0xff] %v891_v37  ;;  %1511 = vst [vmem:[#allocation15_spill] sm:$0xff] %v896_v38  ;;  %v907_v41 = vld [vmem:[%s1455_s0 + $0x58] sm:$0xff]  ;;  %v133_v42 = vadd.f32 %v896_v38, %v891_v37  ;;  %v914_v43 = vld [vmem:[%s1455_s0 + $0x60] sm:$0xff] }
   0xc   :  { %1512 = vst [vmem:[#allocation16_spill] sm:$0xff] %v901_v39  ;;  %v919_v44 = vld [vmem:[%s1455_s0 + $0x68] sm:$0xff]  ;;  %v89_v45 = vadd.f32 %v88_v36, %v882_v33  ;;  %v925_v46 = vld [vmem:[%s1455_s0 + $0x70] sm:$0xff]  ;;  %v932_v48 = vld [vmem:[%s1455_s0 + $0x180] sm:$0xff]  ;;  %126 = vadd.xlane.f32.xlu1 %v125_v34  ;;  %v130_v49 = vadd.f32 %v129_v35, %v872_v31 }
   0xd   :  { %v93_v47 = vadd.f32 %v919_v44, %v914_v43  ;;  %1513 = vst [vmem:[#allocation17_spill] sm:$0xff] %v932_v48  ;;  %v938_v50 = vld [vmem:[%s1455_s0 + $0x178] sm:$0xff]  ;;  %v134_v51 = vadd.f32 %v133_v42, %v901_v39  ;;  %v949_v53 = vld [vmem:[%s1455_s0 + $0x188] sm:$0xff]  ;;  %86 = vadd.xlane.f32.xlu0 %v85_v40  ;;  %v956_v56 = vld [vmem:[%s1455_s0 + $0x190] sm:$0xff] }
   0xe   :  { %1514 = vst [vmem:[#allocation18_spill] sm:$0xff] %v938_v50  ;;  %v944_v52 = vld [vmem:[%s1455_s0 + $0x78] sm:$0xff]  ;;  %1515 = vst [vmem:[#allocation19_spill] sm:$0xff] %v949_v53  ;;  %v90_v54 = vadd.f32 %v89_v45, %v907_v41  ;;  %v138_v57 = vadd.f32 %v949_v53, %v932_v48  ;;  %v963_v58 = vld [vmem:[%s1455_s0 + $0x80] sm:$0xff] }
   0xf   :  { %v94_v55 = vadd.f32 %v93_v47, %v925_v46  ;;  %1516 = vst [vmem:[#allocation20_spill] sm:$0xff] %v956_v56  ;;  %v968_v59 = vld [vmem:[%s1455_s0 + $0x88] sm:$0xff]  ;;  %v973_v60 = vld [vmem:[%s1455_s0 + $0x90] sm:$0xff]  ;;  %v980_v62 = vld [vmem:[%s1455_s0 + $0x1a0] sm:$0xff]  ;;  %v135_v8 = vadd.f32 %v134_v51, %v938_v50 }
  0x10   :  { %v98_v61 = vadd.f32 %v968_v59, %v963_v58  ;;  %1517 = vst [vmem:[#allocation21_spill] sm:$0xff] %v980_v62  ;;  %v985_v63 = vld [vmem:[%s1455_s0 + $0x1a8] sm:$0xff]  ;;  %v990_v3 = vld [vmem:[%s1455_s0 + $0xa0] sm:$0xff]  ;;  %131 = vadd.xlane.f32.xlu1 %v130_v49  ;;  %v996_v10 = vld [vmem:[%s1455_s0 + $0x198] sm:$0xff]  ;;  %v139_v14 = vadd.f32 %v138_v57, %v956_v56 }
  0x11   :  { %1518 = vst [vmem:[#allocation22_spill] sm:$0xff] %v985_v63  ;;  %1519 = vst [vmem:[#allocation23_spill] sm:$0xff] %v996_v10  ;;  %v1002_v15 = vld [vmem:[%s1455_s0 + $0x98] sm:$0xff]  ;;  %v143_v19 = vadd.f32 %v985_v63, %v980_v62  ;;  %v1009_v21 = vld [vmem:[%s1455_s0 + $0xa8] sm:$0xff]  ;;  %91 = vadd.xlane.f32.xlu0 %v90_v54  ;;  %v95_v24 = vadd.f32 %v94_v55, %v944_v52 }
  0x12   :  { %1520 = vst [vmem:[#allocation24_spill] sm:$0xff] %v1009_v21  ;;  %v99_v25 = vadd.f32 %v98_v61, %v973_v60  ;;  %v1016_v28 = vld [vmem:[%s1455_s0 + $0x1b0] sm:$0xff]  ;;  %v103_v30 = vadd.f32 %v1009_v21, %v990_v3  ;;  %v1023_v34 = vld [vmem:[%s1455_s0 + $0x1c0] sm:$0xff]  ;;  %v1028_v35 = vld [vmem:[%s1455_s0 + $0x1c8] sm:$0xff]  ;;  %v140_v45 = vadd.f32 %v139_v14, %v996_v10 }
  0x13   :  { %1521 = vst [vmem:[#allocation25_spill] sm:$0xff] %v1016_v28  ;;  %1522 = vst [vmem:[#allocation26_spill] sm:$0xff] %v1023_v34  ;;  %v1033_v36 = vld [vmem:[%s1455_s0 + $0xb0] sm:$0xff]  ;;  %v1038_v40 = vld [vmem:[%s1455_s0 + $0xc0] sm:$0xff]  ;;  %v144_v49 = vadd.f32 %v143_v19, %v1016_v28  ;;  %v148_v54 = vadd.f32 %v1028_v35, %v1023_v34 }
  0x14   :  { %1523 = vst [vmem:[#allocation27_spill] sm:$0xff] %v1028_v35  ;;  %1524 = vst [vmem:[#allocation28_spill] sm:$0xff] %v1033_v36  ;;  %v1043_v42 = vld [vmem:[%s1455_s0 + $0xc8] sm:$0xff]  ;;  %136 = vadd.xlane.f32.xlu1 %v135_v8  ;;  %v1049_v47 = vld [vmem:[%s1455_s0 + $0x1b8] sm:$0xff]  ;;  %v100_v55 = vadd.f32 %v99_v25, %v1002_v15  ;;  %v104_v57 = vadd.f32 %v103_v30, %v1033_v36 }
  0x15   :  { %1525 = vst [vmem:[#allocation29_spill] sm:$0xff] %v1049_v47  ;;  %v1055_v51 = vld [vmem:[%s1455_s0 + $0xb8] sm:$0xff]  ;;  %96 = vadd.xlane.f32.xlu0 %v95_v24  ;;  %v1064_v61 = vld [vmem:[%s1455_s0 + $0x1d0] sm:$0xff]  ;;  %v108_v8 = vadd.f32 %v1043_v42, %v1038_v40  ;;  %v1071_v14 = vld [vmem:[%s1455_s0 + $0x1e0] sm:$0xff]  ;;  %v145_v28 = vadd.f32 %v144_v49, %v1049_v47 }
  0x16   :  { %1526 = vst [vmem:[#allocation30_spill] sm:$0xff] %v1055_v51  ;;  %1527 = vst [vmem:[#allocation31_spill] sm:$0xff] %v1064_v61  ;;  %v1076_v19 = vld [vmem:[%s1455_s0 + $0x1e8] sm:$0xff]  ;;  %v1081_v24 = vld [vmem:[%s1455_s0 + $0xd0] sm:$0xff]  ;;  %v149_v63 = vadd.f32 %v148_v54, %v1064_v61  ;;  %v105_v35 = vadd.f32 %v104_v57, %v1055_v51 }
  0x17   :  { %1528 = vst [vmem:[#allocation32_spill] sm:$0xff] %v1071_v14  ;;  %1529 = vst [vmem:[#allocation33_spill] sm:$0xff] %v1076_v19  ;;  %v1086_v25 = vld [vmem:[%s1455_s0 + $0xe0] sm:$0xff]  ;;  %v1091_v30 = vld [vmem:[%s1455_s0 + $0xe8] sm:$0xff]  ;;  %v153_v62 = vadd.f32 %v1076_v19, %v1071_v14  ;;  %v109_v50 = vadd.f32 %v108_v8, %v1081_v24 }
  0x18   :  { %1530 = vst [vmem:[#allocation34_spill] sm:$0xff] %v1086_v25  ;;  %1531 = vst [vmem:[#allocation35_spill] sm:$0xff] %v1091_v30  ;;  %141 = vadd.xlane.f32.xlu1 %v140_v45  ;;  %v1101_v34 = vld [vmem:[%s1455_s0 + $0x1d8] sm:$0xff]  ;;  %v1107_v45 = vld [vmem:[%s1455_s0 + $0x1f0] sm:$0xff]  ;;  %v113_v49 = vadd.f32 %v1091_v30, %v1086_v25 }
  0x19   :  { %101 = vadd.xlane.f32.xlu0 %v100_v55  ;;  %1532 = vst [vmem:[#allocation36_spill] sm:$0xff] %v1101_v34  ;;  %1533 = vst [vmem:[#allocation37_spill] sm:$0xff] %v1107_v45  ;;  %v1114_v54 = vld [vmem:[%s1455_s0 + $0xd8] sm:$0xff]  ;;  %v1119_v55 = vld [vmem:[%s1455_s0 + $0xf0] sm:$0xff]  ;;  %v150_v57 = vadd.f32 %v149_v63, %v1101_v34  ;;  %v154_v8 = vadd.f32 %v153_v62, %v1107_v45 }
  0x1a   :  { %1534 = vst [vmem:[#allocation38_spill] sm:$0xff] %v1119_v55  ;;  %v110_v19 = vadd.f32 %v109_v50, %v1114_v54  ;;  %v1127_v14 = vld [vmem:[%s1455_s0 + $0x1f8] sm:$0xff]  ;;  %v114_v47 = vadd.f32 %v113_v49, %v1119_v55  ;;  %v731_v50 = vmov 0.0   ;;  %v368_v49 = vld [vmem:[%s1457_s2 + $0x20] sm:$0xff] }
  0x1b   :  { %1535 = vst [vmem:[#allocation39_spill] sm:$0xff] %v1127_v14  ;;  %v1133_v61 = vld [vmem:[%s1455_s0 + $0xf8] sm:$0xff]  ;;  %v155_v63 = vadd.f32 %v154_v8, %v1127_v14  ;;  %701 = vmatprep.subr.mxu0 %v731_v50  ;;  %706 = vmatprep.subr.mxu1 %v731_v50  ;;  %v366_v8 = vld [vmem:[%s1457_s2 + $0x10] sm:$0xff] }
  0x1c   :  { %146 = vadd.xlane.f32.xlu1 %v145_v28  ;;  %1536 = vst [vmem:[#allocation40_spill] sm:$0xff] %v1133_v61  ;;  %v115_v62 = vadd.f32 %v114_v47, %v1133_v61  ;;  %v174_v28 = vld [vmem:[%s1456_s1] sm:$0xf]  ;;  %703 = vmatprep.mubr.msk.f32.mxu0 %vm732_vm1, %v731_v50  ;;  %v370_v47 = vld [vmem:[%s1457_s2 + $0x30] sm:$0xff] }
  0x1d   :  { %106 = vadd.xlane.f32.xlu0 %v105_v35  ;;  %702 = vmatpush3.xpose.msk.msra.mxu0 %vm287_vm0, %v174_v28  ;;  %v371_v35 = vld [vmem:[%s1457_s2 + $0x38] sm:$0xff] }
  0x1e   :  { %722 = vmatprep.mubr.msk.f32.mxu1 %vm732_vm1, %v731_v50  ;;  %707 = vmatpush3.xpose.msk.msra.mxu1 %vm372_vm2, %v371_v35 }
  0x1f   :  { %708 = vmatprep.subr.mxu1 %v731_v50 }
  0x20   :  { %151 = vadd.xlane.f32.xlu1 %v150_v57  ;;  %v367_v57 = vld [vmem:[%s1457_s2 + $0x18] sm:$0xff] }
  0x21   :  { %111 = vadd.xlane.f32.xlu0 %v110_v19  ;;  %v369_v19 = vld [vmem:[%s1457_s2 + $0x28] sm:$0xff] }
  0x22   :  { %709 = vmatpush3.xpose.msk.msra.mxu1 %vm372_vm2, %v370_v47 }
  0x23   :  { %710 = vmatprep.subr.mxu1 %v731_v50 }
  0x24   :  { %156 = vadd.xlane.f32.xlu1 %v155_v63  ;;  %v365_v63 = vld [vmem:[%s1457_s2 + $0x8] sm:$0xff] }
  0x25   :  { %116 = vadd.xlane.f32.xlu0 %v115_v62 }
  0x26   :  { %711 = vmatpush3.xpose.msk.msra.mxu1 %vm372_vm2, %v369_v19  ;;  %v191_v19 = vlaneseq }
  0x27   :  { %712 = vmatprep.subr.mxu1 %v731_v50 }
  0x28   :  { %v192_v14 = vand.u32 127, %v191_v19  ;;  %v1169_v34 = vshrl.u32 %v191_v19, 7 }
  0x2a   :  { %713 = vmatpush3.xpose.msk.msra.mxu1 %vm372_vm2, %v368_v49  ;;  %v197_v39 = vadd.s32 4294967288, %v192_v14  ;;  %v204_v38 = vadd.s32 4294967280, %v192_v14  ;;  %v211_v37 = vadd.s32 4294967272, %v192_v14  ;;  %v218_v10 = vadd.s32 4294967264, %v192_v14 }
  0x2b   :  { %714 = vmatprep.subr.mxu1 %v731_v50  ;;  %v225_v53 = vadd.s32 4294967256, %v192_v14  ;;  %v232_v13 = vadd.s32 4294967248, %v192_v14 }
  0x2c   :  { %v200_v48 = vsub.s32 %v197_v39, %v1169_v34  ;;  %v207_v20 = vsub.s32 %v204_v38, %v1169_v34  ;;  %v214_v19 = vsub.s32 %v211_v37, %v1169_v34  ;;  %v221_v9 = vsub.s32 %v218_v10, %v1169_v34 }
  0x2d   :  { %v228_v23 = vsub.s32 %v225_v53, %v1169_v34  ;;  %v239_v10 = vadd.s32 4294967240, %v192_v14 }
  0x2e   :  { %715 = vmatpush3.xpose.msk.msra.mxu1 %vm372_vm2, %v367_v57 }
  0x2f   :  { %716 = vmatprep.subr.mxu1 %v731_v50 }
  0x32   :  { %717 = vmatpush3.xpose.msk.msra.mxu1 %vm372_vm2, %v366_v8 }
  0x33   :  { %718 = vmatprep.subr.mxu1 %v731_v50 }
  0x36   :  { %719 = vmatpush3.xpose.msk.msra.mxu1 %vm372_vm2, %v365_v63 }
  0x37   :  { %720 = vmatprep.subr.mxu1 %v731_v50  ;;  %v195_v50 = vsub.s32 %v192_v14, %v1169_v34 }
  0x91   :  { %v122_v62 = vpop.xlane.xlu1 %121 }
  0x92   :  { %v82_v28 = vpop.xlane.xlu0 %81  ;;  %v166_v61 = vmul.f32 0.001953125, %v122_v62 }
  0x93   :  { %v158_v38 = vmul.f32 0.001953125, %v82_v28 }
  0x94   :  { %v249_v51 = vrot.slane %v166_v61, %v195_v50 }
  0x95   :  { %v127_v35 = vpop.xlane.xlu1 %126  ;;  %v196_v21 = vrot.slane %v158_v38, %v195_v50 }
  0x96   :  { %v87_v47 = vpop.xlane.xlu0 %86  ;;  %v167_v12 = vmul.f32 0.001953125, %v127_v35  ;;  %v235_v35 = vsub.s32 %v232_v13, %v1169_v34 }
  0x97   :  { %v159_v31 = vmul.f32 0.001953125, %v87_v47 }
  0x98   :  { %v253_v37 = vrot.slane %v167_v12, %v200_v48 }
  0x99   :  { %v132_v49 = vpop.xlane.xlu1 %131  ;;  %v201_v47 = vrot.slane %v159_v31, %v200_v48 }
  0x9a   :  { %v92_v57 = vpop.xlane.xlu0 %91  ;;  %v168_v27 = vmul.f32 0.001953125, %v132_v49  ;;  %v254_v13 = vsel %vm202_vm3, %v253_v37, %v249_v51  ;;  %v364_v37 = vld [vmem:[%s1457_s2] sm:$0xff] }
  0x9b   :  { %v160_v55 = vmul.f32 0.001953125, %v92_v57  ;;  %721 = vmatpush3.xpose.msk.msra.mxu1 %vm372_vm2, %v364_v37 }
  0x9c   :  { %v258_v49 = vrot.slane %v168_v27, %v207_v20  ;;  %v203_v27 = vsel %vm202_vm3, %v201_v47, %v196_v21 }
  0x9d   :  { %v137_v45 = vpop.xlane.xlu1 %136  ;;  %v208_v62 = vrot.slane %v160_v55, %v207_v20 }
  0x9e   :  { %v97_v8 = vpop.xlane.xlu0 %96  ;;  %v169_v30 = vmul.f32 0.001953125, %v137_v45  ;;  %v259_v31 = vsel %vm209_vm4, %v258_v49, %v254_v13 }
  0x9f   :  { %v161_v25 = vmul.f32 0.001953125, %v97_v8  ;;  %v210_v14 = vsel %vm209_vm4, %v208_v62, %v203_v27 }
  0xa0   :  { %v263_v57 = vrot.slane %v169_v30, %v214_v19 }
  0xa1   :  { %v142_v56 = vpop.xlane.xlu1 %141  ;;  %v215_v28 = vrot.slane %v161_v25, %v214_v19 }
  0xa2   :  { %v102_v63 = vpop.xlane.xlu0 %101  ;;  %v170_v6 = vmul.f32 0.001953125, %v142_v56  ;;  %v264_v30 = vsel %vm216_vm5, %v263_v57, %v259_v31 }
  0xa3   :  { %v162_v2 = vmul.f32 0.001953125, %v102_v63  ;;  %v217_v51 = vsel %vm216_vm5, %v215_v28, %v210_v14 }
  0xa4   :  { %v268_v8 = vrot.slane %v170_v6, %v221_v9 }
  0xa5   :  { %v147_v22 = vpop.xlane.xlu1 %146  ;;  %v222_v12 = vrot.slane %v162_v2, %v221_v9 }
  0xa6   :  { %v107_v39 = vpop.xlane.xlu0 %106  ;;  %v171_v1 = vmul.f32 0.001953125, %v147_v22  ;;  %v242_v22 = vsub.s32 %v239_v10, %v1169_v34 }
  0xa7   :  { %v163_v0 = vmul.f32 0.001953125, %v107_v39  ;;  %v224_v9 = vsel %vm223_vm6, %v222_v12, %v217_v51  ;;  %v513_v12 = vsub.s32 1, %v1169_v34 }
  0xa8   :  { %v273_v63 = vrot.slane %v171_v1, %v228_v23  ;;  %v269_v1 = vsel %vm223_vm6, %v268_v8, %v264_v30  ;;  %v478_v8 = vsub.s32 0, %v1169_v34 }
  0xa9   :  { %v152_v53 = vpop.xlane.xlu1 %151  ;;  %v229_v48 = vrot.slane %v163_v0, %v228_v23 }
  0xaa   :  { %v172_v45 = vmul.f32 0.001953125, %v152_v53  ;;  %v112_v36 = vpop.xlane.xlu0 %111  ;;  %v274_v21 = vsel %vm230_vm7, %v273_v63, %v269_v1 }
  0xab   :  { %v164_v56 = vmul.f32 0.001953125, %v112_v36  ;;  %v231_v23 = vsel %vm230_vm7, %v229_v48, %v224_v9  ;;  %v1540_v9 = vld [vmem:[#allocation2_spill] sm:$0xff] }
  0xac   :  { %v278_v61 = vrot.slane %v172_v45, %v235_v35 }
  0xad   :  { %v157_v20 = vpop.xlane.xlu1 %156  ;;  %v236_v25 = vrot.slane %v164_v56, %v235_v35 }
  0xae   :  { %v173_v6 = vmul.f32 0.001953125, %v157_v20  ;;  %v117_v36 = vpop.xlane.xlu0 %116  ;;  %v279_v55 = vsel %vm237_vm8, %v278_v61, %v274_v21 }
  0xaf   :  { %v165_v2 = vmul.f32 0.001953125, %v117_v36  ;;  %v238_v19 = vsel %vm237_vm8, %v236_v25, %v231_v23 }
  0xb0   :  { %v283_v0 = vrot.slane %v173_v6, %v242_v22 }
  0xb1   :  { %v243_v50 = vrot.slane %v165_v2, %v242_v22 }
  0xb2   :  { %v284_v39 = vsel %vm244_vm9, %v283_v0, %v279_v55  ;;  %v1541_v0 = vld [vmem:[#allocation3_spill] sm:$0xff]  ;;  %v1542_v55 = vld [vmem:[#allocation4_spill] sm:$0xff] }
  0xb3   :  { %v245_v38 = vsel %vm244_vm9, %v243_v50, %v238_v19  ;;  %v1543_v19 = vld [vmem:[#allocation5_spill] sm:$0xff] }
  0xb4   :  { %v286_v35 = vsel %vm285_vm10, %v284_v39, %v245_v38 }
  0xb5   :  { %704 = vmatmul.mubr.msk.f32.vlgmr.msra.gmra.mxu0 %vm287_vm0, %v286_v35  ;;  %v1544_v35 = vld [vmem:[#allocation34_spill] sm:$0xff] }
 0x175   :  { %v359_v10 = vpop.f32.mrf.mxu0 }
 0x176   :  { %v363_v47 = vmax.f32 %v359_v10, 0.0  ;;  %v1545_v10 = vld [vmem:[#allocation35_spill] sm:$0xff] }
 0x177   :  { %v705_v49 = vpop.f32.mrf.mxu0 }
 0x178   :  { %723 = vmatmul.mubr.msk.f32.vlgmr.msra.gmra.mxu1 %vm372_vm2, %v363_v47  ;;  %v1546_v49 = vld [vmem:[#allocation38_spill] sm:$0xff] }
 0x238   :  { %v466_v53 = vpop.f32.mrf.mxu1 }
 0x239   :  { %v689_v62 = vmul.f32 -1.442695, %v466_v53 }
 0x23a   :  { %v724_v57 = vpop.f32.mrf.mxu1 }
 0x23b   :  { %727 = vpow2.f32 %v689_v62  ;;  %v1547_v62 = vld [vmem:[#allocation40_spill] sm:$0xff] }
 0x248   :  { %v728_v45 = vpop.eup %727 }
 0x249   :  { %v473_v28 = vadd.f32 1.0, %v728_v45  ;;  %v1548_v45 = vld [vmem:[#allocation10_spill] sm:$0xff] }
 0x24b   :  { %729 = vrcp.f32 %v473_v28 }
 0x258   :  { %v730_v56 = vpop.eup %729 }
 0x259   :  { %v479_v13 = vrot.slane %v730_v56, %v478_v8  ;;  %v514_v63 = vrot.slane %v730_v56, %v513_v12  ;;  %v1549_v8 = vld [vmem:[#allocation11_spill] sm:$0xff] }
 0x25b   :  { %485 = vbcast.lane.b32.xlu1 %v479_v13, 264  ;;  %481 = vbcast.lane.b32.xlu0 %v479_v13, 256 }
 0x25f   :  { %489 = vbcast.lane.b32.xlu1 %v479_v13, 272  ;;  %497 = vbcast.lane.b32.xlu0 %v479_v13, 288 }
 0x263   :  { %493 = vbcast.lane.b32.xlu1 %v479_v13, 280  ;;  %505 = vbcast.lane.b32.xlu0 %v479_v13, 304 }
 0x267   :  { %501 = vbcast.lane.b32.xlu1 %v479_v13, 296  ;;  %516 = vbcast.lane.b32.xlu0 %v514_v63, 256 }
 0x26b   :  { %509 = vbcast.lane.b32.xlu1 %v479_v13, 312  ;;  %524 = vbcast.lane.b32.xlu0 %v514_v63, 272  ;;  %v1550_v13 = vld [vmem:[#allocation12_spill] sm:$0xff] }
 0x26f   :  { %520 = vbcast.lane.b32.xlu1 %v514_v63, 264  ;;  %532 = vbcast.lane.b32.xlu0 %v514_v63, 288 }
 0x273   :  { %528 = vbcast.lane.b32.xlu1 %v514_v63, 280  ;;  %540 = vbcast.lane.b32.xlu0 %v514_v63, 304 }
 0x277   :  { %536 = vbcast.lane.b32.xlu1 %v514_v63, 296 }
 0x27b   :  { %544 = vbcast.lane.b32.xlu1 %v514_v63, 312  ;;  %v1551_v63 = vld [vmem:[#allocation13_spill] sm:$0xff] }
 0x2cd   :  { %v486_v22 = vpop.permute.xlu1 %485  ;;  %v482_v27 = vpop.permute.xlu0 %481 }
 0x2ce   :  { %v550_v31 = vmul.f32 %v486_v22, %v819_v16  ;;  %v551_v48 = vmul.f32 %v486_v22, %v824_v17  ;;  %v552_v34 = vmul.f32 %v486_v22, %v829_v18  ;;  %v553_v61 = vmul.f32 %v486_v22, %v854_v26 }
 0x2cf   :  { %v546_v20 = vmul.f32 %v482_v27, %v773_v4  ;;  %v547_v14 = vmul.f32 %v482_v27, %v778_v5  ;;  %v548_v30 = vmul.f32 %v482_v27, %v788_v7  ;;  %v549_v25 = vmul.f32 %v482_v27, %v801_v11 }
 0x2d0   :  { %614 = vst [vmem:[%s1458_s3 + $0x20] sm:$0xff] %v550_v31  ;;  %615 = vst [vmem:[%s1458_s3 + $0x28] sm:$0xff] %v551_v48  ;;  %v1552_v48 = vld [vmem:[#allocation6_spill] sm:$0xff] }
 0x2d1   :  { %616 = vst [vmem:[%s1458_s3 + $0x30] sm:$0xff] %v552_v34  ;;  %617 = vst [vmem:[%s1458_s3 + $0x38] sm:$0xff] %v553_v61  ;;  %v490_v4 = vpop.permute.xlu1 %489  ;;  %v498_v5 = vpop.permute.xlu0 %497  ;;  %v1553_v61 = vld [vmem:[#allocation7_spill] sm:$0xff] }
 0x2d2   :  { %610 = vst [vmem:[%s1458_s3] sm:$0xff] %v546_v20  ;;  %611 = vst [vmem:[%s1458_s3 + $0x8] sm:$0xff] %v547_v14  ;;  %v554_v7 = vmul.f32 %v490_v4, %v866_v29  ;;  %v555_v11 = vmul.f32 %v490_v4, %v877_v32  ;;  %v556_v16 = vmul.f32 %v490_v4, %v882_v33  ;;  %v1554_v14 = vld [vmem:[#allocation8_spill] sm:$0xff] }
 0x2d3   :  { %612 = vst [vmem:[%s1458_s3 + $0x10] sm:$0xff] %v548_v30  ;;  %613 = vst [vmem:[%s1458_s3 + $0x18] sm:$0xff] %v549_v25  ;;  %v557_v17 = vmul.f32 %v490_v4, %v907_v41  ;;  %v562_v18 = vmul.f32 %v498_v5, %v963_v58  ;;  %v563_v26 = vmul.f32 %v498_v5, %v968_v59  ;;  %v1555_v25 = vld [vmem:[#allocation9_spill] sm:$0xff] }
 0x2d4   :  { %v564_v6 = vmul.f32 %v498_v5, %v973_v60  ;;  %v565_v36 = vmul.f32 %v498_v5, %v1002_v15  ;;  %618 = vst [vmem:[%s1458_s3 + $0x40] sm:$0xff] %v554_v7  ;;  %619 = vst [vmem:[%s1458_s3 + $0x48] sm:$0xff] %v555_v11  ;;  %v1556_v5 = vld [vmem:[#allocation17_spill] sm:$0xff]  ;;  %v1557_v11 = vld [vmem:[#allocation19_spill] sm:$0xff] }
 0x2d5   :  { %620 = vst [vmem:[%s1458_s3 + $0x50] sm:$0xff] %v556_v16  ;;  %621 = vst [vmem:[%s1458_s3 + $0x58] sm:$0xff] %v557_v17  ;;  %v494_v29 = vpop.permute.xlu1 %493  ;;  %v506_v32 = vpop.permute.xlu0 %505  ;;  %v1558_v17 = vld [vmem:[#allocation20_spill] sm:$0xff] }
 0x2d6   :  { %626 = vst [vmem:[%s1458_s3 + $0x80] sm:$0xff] %v562_v18  ;;  %627 = vst [vmem:[%s1458_s3 + $0x88] sm:$0xff] %v563_v26  ;;  %v558_v33 = vmul.f32 %v494_v29, %v914_v43  ;;  %v559_v41 = vmul.f32 %v494_v29, %v919_v44  ;;  %v560_v58 = vmul.f32 %v494_v29, %v925_v46  ;;  %v1559_v26 = vld [vmem:[#allocation23_spill] sm:$0xff] }
 0x2d7   :  { %628 = vst [vmem:[%s1458_s3 + $0x90] sm:$0xff] %v564_v6  ;;  %629 = vst [vmem:[%s1458_s3 + $0x98] sm:$0xff] %v565_v36  ;;  %v561_v59 = vmul.f32 %v494_v29, %v944_v52  ;;  %v570_v60 = vmul.f32 %v506_v32, %v1038_v40  ;;  %v571_v15 = vmul.f32 %v506_v32, %v1043_v42  ;;  %v1537_v52 = vld [vmem:[#allocation24_spill] sm:$0xff] }
 0x2d8   :  { %v572_v51 = vmul.f32 %v506_v32, %v1081_v24  ;;  %v573_v1 = vmul.f32 %v506_v32, %v1114_v54  ;;  %622 = vst [vmem:[%s1458_s3 + $0x60] sm:$0xff] %v558_v33  ;;  %623 = vst [vmem:[%s1458_s3 + $0x68] sm:$0xff] %v559_v41  ;;  %v1538_v42 = vld [vmem:[#allocation28_spill] sm:$0xff]  ;;  %v1539_v54 = vld [vmem:[#allocation30_spill] sm:$0xff] }
 0x2d9   :  { %624 = vst [vmem:[%s1458_s3 + $0x70] sm:$0xff] %v560_v58  ;;  %625 = vst [vmem:[%s1458_s3 + $0x78] sm:$0xff] %v561_v59  ;;  %v502_v43 = vpop.permute.xlu1 %501  ;;  %v517_v44 = vpop.permute.xlu0 %516  ;;  %v1560_v32 = vld [vmem:[#allocation14_spill] sm:$0xff]  ;;  %v1561_v41 = vld [vmem:[#allocation15_spill] sm:$0xff] }
 0x2da   :  { %634 = vst [vmem:[%s1458_s3 + $0xc0] sm:$0xff] %v570_v60  ;;  %635 = vst [vmem:[%s1458_s3 + $0xc8] sm:$0xff] %v571_v15  ;;  %v566_v46 = vmul.f32 %v502_v43, %v990_v3  ;;  %v567_v40 = vmul.f32 %v502_v43, %v1537_v52  ;;  %v568_v24 = vmul.f32 %v502_v43, %v1538_v42  ;;  %v1562_v59 = vld [vmem:[#allocation16_spill] sm:$0xff]  ;;  %v1563_v15 = vld [vmem:[#allocation18_spill] sm:$0xff] }
 0x2db   :  { %636 = vst [vmem:[%s1458_s3 + $0xd0] sm:$0xff] %v572_v51  ;;  %637 = vst [vmem:[%s1458_s3 + $0xd8] sm:$0xff] %v573_v1  ;;  %v569_v2 = vmul.f32 %v502_v43, %v1539_v54  ;;  %v578_v21 = vmul.f32 %v517_v44, %v1540_v9  ;;  %v579_v23 = vmul.f32 %v517_v44, %v1541_v0  ;;  %v1564_v1 = vld [vmem:[#allocation26_spill] sm:$0xff]  ;;  %v1566_v52 = vld [vmem:[#allocation31_spill] sm:$0xff] }
 0x2dc   :  { %v580_v50 = vmul.f32 %v517_v44, %v1542_v55  ;;  %v581_v39 = vmul.f32 %v517_v44, %v1543_v19  ;;  %630 = vst [vmem:[%s1458_s3 + $0xa0] sm:$0xff] %v566_v46  ;;  %631 = vst [vmem:[%s1458_s3 + $0xa8] sm:$0xff] %v567_v40  ;;  %v1565_v44 = vld [vmem:[#allocation27_spill] sm:$0xff]  ;;  %v1567_v42 = vld [vmem:[#allocation36_spill] sm:$0xff] }
 0x2dd   :  { %632 = vst [vmem:[%s1458_s3 + $0xb0] sm:$0xff] %v568_v24  ;;  %633 = vst [vmem:[%s1458_s3 + $0xb8] sm:$0xff] %v569_v2  ;;  %v510_v3 = vpop.permute.xlu1 %509  ;;  %v525_v38 = vpop.permute.xlu0 %524  ;;  %v1568_v2 = vld [vmem:[#allocation21_spill] sm:$0xff] }
 0x2de   :  { %642 = vst [vmem:[%s1458_s3 + $0x100] sm:$0xff] %v578_v21  ;;  %643 = vst [vmem:[%s1458_s3 + $0x108] sm:$0xff] %v579_v23  ;;  %v574_v37 = vmul.f32 %v510_v3, %v1544_v35  ;;  %v575_v47 = vmul.f32 %v510_v3, %v1545_v10  ;;  %v576_v53 = vmul.f32 %v510_v3, %v1546_v49  ;;  %v1569_v21 = vld [vmem:[#allocation22_spill] sm:$0xff]  ;;  %v1570_v23 = vld [vmem:[#allocation25_spill] sm:$0xff] }
 0x2df   :  { %644 = vst [vmem:[%s1458_s3 + $0x110] sm:$0xff] %v580_v50  ;;  %645 = vst [vmem:[%s1458_s3 + $0x118] sm:$0xff] %v581_v39  ;;  %v577_v57 = vmul.f32 %v510_v3, %v1547_v62  ;;  %v586_v28 = vmul.f32 %v525_v38, %v1548_v45  ;;  %v587_v56 = vmul.f32 %v525_v38, %v1549_v8  ;;  %v1571_v50 = vld [vmem:[#allocation29_spill] sm:$0xff]  ;;  %v1572_v3 = vld [vmem:[#allocation32_spill] sm:$0xff] }
 0x2e0   :  { %v588_v12 = vmul.f32 %v525_v38, %v1550_v13  ;;  %v589_v22 = vmul.f32 %v525_v38, %v1551_v63  ;;  %638 = vst [vmem:[%s1458_s3 + $0xe0] sm:$0xff] %v574_v37  ;;  %639 = vst [vmem:[%s1458_s3 + $0xe8] sm:$0xff] %v575_v47  ;;  %v1573_v35 = vld [vmem:[#allocation33_spill] sm:$0xff]  ;;  %v1575_v49 = vld [vmem:[#allocation39_spill] sm:$0xff] }
 0x2e1   :  { %640 = vst [vmem:[%s1458_s3 + $0xf0] sm:$0xff] %v576_v53  ;;  %641 = vst [vmem:[%s1458_s3 + $0xf8] sm:$0xff] %v577_v57  ;;  %v521_v27 = vpop.permute.xlu1 %520  ;;  %v533_v31 = vpop.permute.xlu0 %532  ;;  %v1574_v10 = vld [vmem:[#allocation37_spill] sm:$0xff] }
 0x2e2   :  { %650 = vst [vmem:[%s1458_s3 + $0x140] sm:$0xff] %v586_v28  ;;  %651 = vst [vmem:[%s1458_s3 + $0x148] sm:$0xff] %v587_v56  ;;  %v582_v34 = vmul.f32 %v521_v27, %v1552_v48  ;;  %v583_v20 = vmul.f32 %v521_v27, %v1553_v61  ;;  %v584_v30 = vmul.f32 %v521_v27, %v1554_v14 }
 0x2e3   :  { %652 = vst [vmem:[%s1458_s3 + $0x150] sm:$0xff] %v588_v12  ;;  %653 = vst [vmem:[%s1458_s3 + $0x158] sm:$0xff] %v589_v22  ;;  %v585_v4 = vmul.f32 %v521_v27, %v1555_v25  ;;  %v594_v7 = vmul.f32 %v533_v31, %v1556_v5  ;;  %v595_v16 = vmul.f32 %v533_v31, %v1557_v11 }
 0x2e4   :  { %v596_v18 = vmul.f32 %v533_v31, %v1558_v17  ;;  %v597_v6 = vmul.f32 %v533_v31, %v1559_v26  ;;  %646 = vst [vmem:[%s1458_s3 + $0x120] sm:$0xff] %v582_v34  ;;  %647 = vst [vmem:[%s1458_s3 + $0x128] sm:$0xff] %v583_v20 }
 0x2e5   :  { %648 = vst [vmem:[%s1458_s3 + $0x130] sm:$0xff] %v584_v30  ;;  %649 = vst [vmem:[%s1458_s3 + $0x138] sm:$0xff] %v585_v4  ;;  %v529_v36 = vpop.permute.xlu1 %528  ;;  %v541_v29 = vpop.permute.xlu0 %540 }
 0x2e6   :  { %658 = vst [vmem:[%s1458_s3 + $0x180] sm:$0xff] %v594_v7  ;;  %659 = vst [vmem:[%s1458_s3 + $0x188] sm:$0xff] %v595_v16  ;;  %v590_v33 = vmul.f32 %v529_v36, %v1560_v32  ;;  %v591_v58 = vmul.f32 %v529_v36, %v1561_v41  ;;  %v592_v60 = vmul.f32 %v529_v36, %v1562_v59 }
 0x2e7   :  { %660 = vst [vmem:[%s1458_s3 + $0x190] sm:$0xff] %v596_v18  ;;  %661 = vst [vmem:[%s1458_s3 + $0x198] sm:$0xff] %v597_v6  ;;  %v593_v51 = vmul.f32 %v529_v36, %v1563_v15  ;;  %v602_v43 = vmul.f32 %v541_v29, %v1564_v1  ;;  %v603_v46 = vmul.f32 %v541_v29, %v1565_v44 }
 0x2e8   :  { %v604_v40 = vmul.f32 %v541_v29, %v1566_v52  ;;  %v605_v24 = vmul.f32 %v541_v29, %v1567_v42  ;;  %654 = vst [vmem:[%s1458_s3 + $0x160] sm:$0xff] %v590_v33  ;;  %655 = vst [vmem:[%s1458_s3 + $0x168] sm:$0xff] %v591_v58 }
 0x2e9   :  { %656 = vst [vmem:[%s1458_s3 + $0x170] sm:$0xff] %v592_v60  ;;  %657 = vst [vmem:[%s1458_s3 + $0x178] sm:$0xff] %v593_v51  ;;  %v537_v54 = vpop.permute.xlu1 %536 }
 0x2ea   :  { %666 = vst [vmem:[%s1458_s3 + $0x1c0] sm:$0xff] %v602_v43  ;;  %667 = vst [vmem:[%s1458_s3 + $0x1c8] sm:$0xff] %v603_v46  ;;  %v598_v9 = vmul.f32 %v537_v54, %v1568_v2  ;;  %v599_v0 = vmul.f32 %v537_v54, %v1569_v21  ;;  %v600_v55 = vmul.f32 %v537_v54, %v1570_v23 }
 0x2eb   :  { %668 = vst [vmem:[%s1458_s3 + $0x1d0] sm:$0xff] %v604_v40  ;;  %669 = vst [vmem:[%s1458_s3 + $0x1d8] sm:$0xff] %v605_v24  ;;  %v601_v19 = vmul.f32 %v537_v54, %v1571_v50 }
 0x2ec   :  { %662 = vst [vmem:[%s1458_s3 + $0x1a0] sm:$0xff] %v598_v9  ;;  %663 = vst [vmem:[%s1458_s3 + $0x1a8] sm:$0xff] %v599_v0 }
 0x2ed   :  { %664 = vst [vmem:[%s1458_s3 + $0x1b0] sm:$0xff] %v600_v55  ;;  %665 = vst [vmem:[%s1458_s3 + $0x1b8] sm:$0xff] %v601_v19  ;;  %v545_v39 = vpop.permute.xlu1 %544 }
 0x2ee   :  { %v606_v38 = vmul.f32 %v545_v39, %v1572_v3  ;;  %v607_v37 = vmul.f32 %v545_v39, %v1573_v35  ;;  %v608_v47 = vmul.f32 %v545_v39, %v1574_v10  ;;  %v609_v53 = vmul.f32 %v545_v39, %v1575_v49 }
 0x2f0   :  { %670 = vst [vmem:[%s1458_s3 + $0x1e0] sm:$0xff] %v606_v38  ;;  %671 = vst [vmem:[%s1458_s3 + $0x1e8] sm:$0xff] %v607_v37 }
 0x2f1   :  { %672 = vst [vmem:[%s1458_s3 + $0x1f0] sm:$0xff] %v608_v47  ;;  %673 = vst [vmem:[%s1458_s3 + $0x1f8] sm:$0xff] %v609_v53 }

</bundles_post_ra>
